<compile_context>
chip_gen: v5e
topology: v5e:2x2
jax: 0.10.0
libtpu: 0.0.40
codegen_flags: <defaults>
</compile_context>

<pallas_src>
import functools

import jax
import jax.numpy as jnp
from jax.experimental import pallas as pl
from jax.experimental.pallas import tpu as pltpu

IN_DIM = 784
HID = 8
OUT = 10
HID_PAD = 128          # hidden width zero-padded to one full lane group
IN_DIM_PHYS = 896      # ceil(784/128)*128: physical lane footprint of an x row in VMEM


def _round_up(n, m):
    return ((n + m - 1) // m) * m


def _default_block_b():
    """Generation-aware batch tile default."""
    try:
        kind = jax.devices()[0].device_kind.lower()
    except Exception:
        return 1024
    if "v7" in kind or "7x" in kind:
        return 4096      # per-step overhead amortization matters at 3.2 TB/s HBM
    return 1024          # v5e / v6e: DMA engine already saturated at 512-1024 rows


def _fc_kernel(negative_slope, x_ref, w1_ref, b1_ref, w2_ref, b2_ref, o_ref):
    # x_ref:  (tb, 784) f32     w1_ref: (784, 128) bf16   b1_ref: (1, 128) f32
    # w2_ref: (128, 10) f32     b2_ref: (1, 10)  f32      o_ref:  (tb, 10) f32
    #
    # Cast x in-register for the MXU (bf16 inputs, f32 accumulation): HBM still
    # reads f32 x (no extra wrapper pass), but the MXU avoids f32 multi-pass cost.
    x = x_ref[...].astype(w1_ref.dtype)
    h = jnp.dot(x, w1_ref[...], preferred_element_type=jnp.float32) + b1_ref[...]
    h = jnp.where(h >= 0, h, negative_slope * h)            # LeakyReLU
    y = jnp.dot(h, w2_ref[...], preferred_element_type=jnp.float32) + b2_ref[...]
    o_ref[...] = y.astype(o_ref.dtype)


def fc_forward(x, w1, b1, w2, b2, *, negative_slope, block_b=None):
    """Forward pass of FC.

    Args:
      x:  (B, 1, 28, 28) float32 (NCHW, like PyTorch).
      w1: (8, 784)  PyTorch-layout weight of self.features.
      b1: (8,)      bias of self.features.
      w2: (10, 8)   PyTorch-layout weight of self.classifier.
      b2: (10,)     bias of self.classifier.
      negative_slope: LeakyReLU negative slope (Python float).
      block_b: batch tile (rows of x per grid step). Default is per-generation.
    Returns:
      (B, 10) float32 logits.
    """
    B = x.shape[0]
    x_flat = x.reshape(B, IN_DIM).astype(jnp.float32)       # torch.flatten(x, 1)

    if block_b is None:
        block_b = _default_block_b()

    # Batch tile: multiple of 8 sublanes; no padded copy of x (Pallas masks the
    # ragged last block). Keep >=2 grid steps whenever there is more than one
    # 8-row tile of work so both v7x TensorCores get a share (no-op on v5e/v6e).
    tb = min(_round_up(block_b, 8), _round_up(B, 8))
    if _round_up(B, 8) > 8 and pl.cdiv(B, tb) < 2:
        tb = _round_up(pl.cdiv(B, 2), 8)
    grid = (pl.cdiv(B, tb),)

    # Weights pre-transposed to (in, out). First layer: bf16 MXU inputs, hidden
    # zero-padded to 128 lanes (lane-dense VPU LeakyReLU, zero lanes stay zero).
    # Second layer stays narrow (10 output lanes) so the kernel writes exactly
    # (B, 10) and no output padding ever hits HBM.
    w1_p = jnp.zeros((IN_DIM, HID_PAD), jnp.bfloat16).at[:, :HID].set(
        w1.T.astype(jnp.bfloat16))
    b1_p = jnp.zeros((1, HID_PAD), jnp.float32).at[:, :HID].set(b1.reshape(1, HID))
    w2_p = jnp.zeros((HID_PAD, OUT), jnp.float32).at[:HID, :].set(w2.T)
    b2_p = b2.reshape(1, OUT).astype(jnp.float32)

    kernel = functools.partial(_fc_kernel, negative_slope)

    # Advisory: bandwidth-bound, tiny flops.
    cost = pl.CostEstimate(
        flops=2 * B * IN_DIM * HID_PAD + 2 * B * HID_PAD * OUT,
        transcendentals=0,
        bytes_accessed=(B * IN_DIM * 4 + B * OUT * 4
                        + IN_DIM * HID_PAD * 2 + HID_PAD * 4
                        + HID_PAD * OUT * 4 + OUT * 4),
    )

    # VMEM budget from physical footprints (lane-rounded last dims), with
    # headroom, capped below v7x's 64 MiB to leave room for Mosaic scratch.
    vmem_needed = (
        2 * tb * IN_DIM_PHYS * 4                        # double-buffered x tiles (784 -> 896 lanes)
        + 2 * tb * 128 * 4                              # double-buffered out tiles (10 -> 128 lanes)
        + 2 * (IN_DIM * HID_PAD * 2                     # w1 (bf16), resident but 2-buffered
               + 8 * HID_PAD * 4                        # b1
               + HID_PAD * 128 * 4                      # w2 (10 -> 128 lanes)
               + 8 * 128 * 4))                          # b2
    vmem_limit = max(16 << 20, min(vmem_needed + (8 << 20), 56 << 20))

    out = pl.pallas_call(
        kernel,
        out_shape=jax.ShapeDtypeStruct((B, OUT), jnp.float32),
        grid=grid,
        in_specs=[
            # x: tiled over the batch grid -> pipelined HBM->VMEM prefetch.
            pl.BlockSpec((tb, IN_DIM), lambda i: (i, 0)),
            # Weights / biases: constant block index -> fetched once, VMEM-resident.
            pl.BlockSpec((IN_DIM, HID_PAD), lambda i: (0, 0)),
            pl.BlockSpec((1, HID_PAD), lambda i: (0, 0)),
            pl.BlockSpec((HID_PAD, OUT), lambda i: (0, 0)),
            pl.BlockSpec((1, OUT), lambda i: (0, 0)),
        ],
        out_specs=pl.BlockSpec((tb, OUT), lambda i: (i, 0)),
        compiler_params=pltpu.CompilerParams(
            dimension_semantics=("parallel",),
            vmem_limit_bytes=vmem_limit,
        ),
        cost_estimate=cost,
    )(x_flat, w1_p, b1_p, w2_p, b2_p)

    return out


def _reference(x, w1, b1, w2, b2, negative_slope):
    x_flat = x.reshape(x.shape[0], -1)
    h = x_flat @ w1.T + b1
    h = jnp.where(h >= 0, h, negative_slope * h)
    return h @ w2.T + b2


if __name__ == "__main__":
    key = jax.random.PRNGKey(0)
    k_x, k_w1, k_b1, k_w2, k_b2 = jax.random.split(key, 5)

    B = 2
    negative_slope = 0.1

    # Deterministic synthetic parameters (PyTorch Linear layout: (out, in)).
    x = jax.random.normal(k_x, (B, 1, 28, 28), dtype=jnp.float32)
    w1 = jax.random.normal(k_w1, (8, 784), dtype=jnp.float32) * 0.05
    b1 = jax.random.normal(k_b1, (8,), dtype=jnp.float32) * 0.05
    w2 = jax.random.normal(k_w2, (10, 8), dtype=jnp.float32) * 0.05
    b2 = jax.random.normal(k_b2, (10,), dtype=jnp.float32) * 0.05

    out = fc_forward(x, w1, b1, w2, b2, negative_slope=negative_slope)
    out = jax.block_until_ready(out)

    ref = _reference(x, w1, b1, w2, b2, negative_slope)
    assert out.shape == (B, 10), out.shape
    # bf16 MXU inputs (f32 accumulation) for the first matmul -> ~1e-3 level error.
    assert jnp.allclose(out, ref, atol=1e-2, rtol=1e-2), (out, ref)

    print("KERNEL_OK")
</pallas_src>

<mosaic_0001>
module attributes {stable_mosaic.version = 11 : i64} {
  func.func @_fc_kernel(%arg0: i32, %arg1: memref<8x784xf32, #tpu.memory_space<vmem>>, %arg2: memref<784x128xbf16, #tpu.memory_space<vmem>>, %arg3: memref<1x128xf32, #tpu.memory_space<vmem>>, %arg4: memref<128x10xf32, #tpu.memory_space<vmem>>, %arg5: memref<1x10xf32, #tpu.memory_space<vmem>>, %arg6: memref<8x10xf32, #tpu.memory_space<vmem>>) attributes {dimension_semantics = [#tpu.dimension_semantics<parallel>], iteration_bounds = array<i64: 1>, scalar_prefetch = 0 : i64, scratch_operands = 0 : i64, tpu.core_type = #tpu.core_type<tc>, window_params = [{transform_indices = @transform_0, window_bounds = array<i64: 8, 784>}, {pipeline_mode = #tpu.pipeline_mode<synchronous>, transform_indices = @transform_1, window_bounds = array<i64: 784, 128>}, {pipeline_mode = #tpu.pipeline_mode<synchronous>, transform_indices = @transform_2, window_bounds = array<i64: 1, 128>}, {pipeline_mode = #tpu.pipeline_mode<synchronous>, transform_indices = @transform_3, window_bounds = array<i64: 128, 10>}, {pipeline_mode = #tpu.pipeline_mode<synchronous>, transform_indices = @transform_4, window_bounds = array<i64: 1, 10>}, {transform_indices = @transform_5, window_bounds = array<i64: 8, 10>}]} {
    %c0 = arith.constant 0 : index
    %c0_0 = arith.constant 0 : index
    %0 = vector.load %arg1[%c0, %c0_0] : memref<8x784xf32, #tpu.memory_space<vmem>>, vector<8x784xf32>
    %1 = arith.truncf %0 : vector<8x784xf32> to vector<8x784xbf16>
    %c0_1 = arith.constant 0 : index
    %c0_2 = arith.constant 0 : index
    %2 = vector.load %arg2[%c0_1, %c0_2] : memref<784x128xbf16, #tpu.memory_space<vmem>>, vector<784x128xbf16>
    %cst = arith.constant dense<0.000000e+00> : vector<8x128xf32>
    %3 = tpu.matmul %1, %2, %cst {dimension_numbers = #tpu.dot_dimension_numbers<[1], [0], [0], [1], [0, 0, 1, 1], [], []>} : vector<8x784xbf16>, vector<784x128xbf16>, vector<8x128xf32> -> vector<8x128xf32>
    %c0_3 = arith.constant 0 : index
    %c0_4 = arith.constant 0 : index
    %4 = vector.load %arg3[%c0_3, %c0_4] : memref<1x128xf32, #tpu.memory_space<vmem>>, vector<1x128xf32>
    %5 = vector.broadcast %4 : vector<1x128xf32> to vector<8x128xf32>
    %6 = arith.addf %3, %5 : vector<8x128xf32>
    %cst_5 = arith.constant 0.000000e+00 : f32
    %7 = vector.broadcast %cst_5 : f32 to vector<8x128xf32>
    %8 = arith.cmpf oge, %6, %7 : vector<8x128xf32>
    %cst_6 = arith.constant 1.000000e-01 : f32
    %9 = vector.broadcast %cst_6 : f32 to vector<8x128xf32>
    %10 = arith.mulf %9, %6 : vector<8x128xf32>
    %11 = arith.select %8, %6, %10 : vector<8x128xi1>, vector<8x128xf32>
    %c0_7 = arith.constant 0 : index
    %c0_8 = arith.constant 0 : index
    %12 = vector.load %arg4[%c0_7, %c0_8] : memref<128x10xf32, #tpu.memory_space<vmem>>, vector<128x10xf32>
    %cst_9 = arith.constant dense<0.000000e+00> : vector<8x10xf32>
    %13 = tpu.matmul %11, %12, %cst_9 {dimension_numbers = #tpu.dot_dimension_numbers<[1], [0], [0], [1], [0, 0, 1, 1], [], []>} : vector<8x128xf32>, vector<128x10xf32>, vector<8x10xf32> -> vector<8x10xf32>
    %c0_10 = arith.constant 0 : index
    %c0_11 = arith.constant 0 : index
    %14 = vector.load %arg5[%c0_10, %c0_11] : memref<1x10xf32, #tpu.memory_space<vmem>>, vector<1x10xf32>
    %15 = vector.broadcast %14 : vector<1x10xf32> to vector<8x10xf32>
    %16 = arith.addf %13, %15 : vector<8x10xf32>
    %c0_12 = arith.constant 0 : index
    %c0_13 = arith.constant 0 : index
    %17 = vector.load %arg6[%c0_12, %c0_13] : memref<8x10xf32, #tpu.memory_space<vmem>>, vector<8x10xf32>
    tpu.vector_store %arg6[%c0_12, %c0_13], %16 {strides = array<i32>} : memref<8x10xf32, #tpu.memory_space<vmem>>, vector<8x10xf32>,
    return
  }
  func.func @transform_0(%arg0: i32) -> (i32, i32) {
    %c0_i32 = arith.constant 0 : i32
    %c0_i32_0 = arith.constant 0 : i32
    return %arg0, %c0_i32 : i32, i32
  }
  func.func @transform_1(%arg0: i32) -> (i32, i32) {
    %c0_i32 = arith.constant 0 : i32
    %c0_i32_0 = arith.constant 0 : i32
    %c0_i32_1 = arith.constant 0 : i32
    return %c0_i32, %c0_i32_0 : i32, i32
  }
  func.func @transform_2(%arg0: i32) -> (i32, i32) {
    %c0_i32 = arith.constant 0 : i32
    %c0_i32_0 = arith.constant 0 : i32
    %c0_i32_1 = arith.constant 0 : i32
    return %c0_i32, %c0_i32_0 : i32, i32
  }
  func.func @transform_3(%arg0: i32) -> (i32, i32) {
    %c0_i32 = arith.constant 0 : i32
    %c0_i32_0 = arith.constant 0 : i32
    %c0_i32_1 = arith.constant 0 : i32
    return %c0_i32, %c0_i32_0 : i32, i32
  }
  func.func @transform_4(%arg0: i32) -> (i32, i32) {
    %c0_i32 = arith.constant 0 : i32
    %c0_i32_0 = arith.constant 0 : i32
    %c0_i32_1 = arith.constant 0 : i32
    return %c0_i32, %c0_i32_0 : i32, i32
  }
  func.func @transform_5(%arg0: i32) -> (i32, i32) {
    %c0_i32 = arith.constant 0 : i32
    %c0_i32_0 = arith.constant 0 : i32
    return %arg0, %c0_i32 : i32, i32
  }
}

</mosaic_0001>

<bundles_post_ra>
// kernel: tpu_custom_call.1
= control target key start
LH: loop header
LB: loop body
LE: loop exit
PB: predicated region body
PF: predicated region fallthrough
CT: control target
= control target key end

     0   :  { %10 = vsyncpa [#allocation3], 0  ;;  %s1071_s0 = inlined_call_operand.vmem [shape: f32[2,784], index: 0, kind: input, shape index: {}]   ;;  %s1072_s1 = inlined_call_operand.hbm [shape: bf16[784,128], index: 1, kind: input, shape index: {}]   ;;  %s1073_s2 = inlined_call_operand.vmem [shape: f32[1,128], index: 2, kind: input, shape index: {}]   ;;  %s1074_s3 = inlined_call_operand.vmem [shape: f32[128,10], index: 3, kind: input, shape index: {}]   ;;  %s1075_s4 = inlined_call_operand.vmem [shape: f32[1,10], index: 4, kind: input, shape index: {}]   ;;  %s1076_s5 = inlined_call_operand.hbm [shape: f32[2,10], index: 5, kind: output, shape index: {}]  }
   0x1   :  { %11 = vsyncpa [#allocation4], 0  ;;  %s18_s20 = sshll.u32 %s1072_s1, 4  ;;  %s951_s21 = smov [#allocation2]   ;;  %s19_s20 = int_to_ptr.hbm [resolvable:$true] %s18_s20 }
   0x2   :  { %s20_s22 = sshll.u32 %s951_s21, 4  ;;  %s952_s23 = smov 64   ;;  %s21_s22 = int_to_ptr.vmem [resolvable:$true] %s20_s22 }
   0x3   :  { %s953_s24 = smov 4  }
   0x4   :  { %26 = dma.hbm_to_vmem [thread:$0]  %s19_s20, 6272, %s21_s22, [#allocation3], %s952_s23, %s952_s23, %s953_s24  }
   0x5   :  { %947 = dma.done.wait [#allocation3], 6272  }
   0x6   :  { %948 = vsyncadd [#allocation3], 4294961024  ;;  %v849_v0 = vld [vmem:[#allocation2 + $0x38] sm:$0xff]  ;;  %v848_v3 = vld [vmem:[#allocation2 + $0x30] sm:$0xff]  ;;  %vm486_vm0 = vcmask 130048   ;;  %vm624_vm2 = vcmask 80896  }
   0x7   :  { %v857_v1 = vld [vmem:[#allocation2 + $0x78] sm:$0xff]  ;;  %490 = vmatpush.bf16.msra.mxu0 %v849_v0  ;;  %v856_v4 = vld [vmem:[#allocation2 + $0x70] sm:$0xff]  ;;  %v847_v8 = vld [vmem:[#allocation2 + $0x28] sm:$0xff] }
   0x8   :  { %v865_v2 = vld [vmem:[#allocation2 + $0xb8] sm:$0xff]  ;;  %503 = vmatpush.bf16.msra.mxu1 %v857_v1  ;;  %v864_v5 = vld [vmem:[#allocation2 + $0xb0] sm:$0xff]  ;;  %v855_v9 = vld [vmem:[#allocation2 + $0x68] sm:$0xff] }
   0x9   :  { %516 = vmatpush.bf16.msra.mxu2 %v865_v2  ;;  %v873_v6 = vld [vmem:[#allocation2 + $0xf8] sm:$0xff]  ;;  %v872_v7 = vld [vmem:[#allocation2 + $0xf0] sm:$0xff]  ;;  %v863_v10 = vld [vmem:[#allocation2 + $0xa8] sm:$0xff] }
   0xa   :  { %529 = vmatpush.bf16.msra.mxu3 %v873_v6  ;;  %v871_v11 = vld [vmem:[#allocation2 + $0xe8] sm:$0xff]  ;;  %v846_v12 = vld [vmem:[#allocation2 + $0x20] sm:$0xff]  ;;  %v38_v15 = vld [vmem:[%s1071_s0] sm:$0xff] }
   0xb   :  { %491 = vmatpush.bf16.msra.mxu0 %v848_v3  ;;  %v854_v13 = vld [vmem:[#allocation2 + $0x60] sm:$0xff]  ;;  %v42_v17 = vld [vmem:[%s1071_s0 + $0x1c] sm:$0xff]  ;;  %54 = vst [vmem:[#allocation1] ss:$4 sm:$0xff] %v38_v15  ;;  %v41_v25 = vld [vmem:[%s1071_s0 + $0x16] sm:$0x3f] }
   0xc   :  { %504 = vmatpush.bf16.msra.mxu1 %v856_v4  ;;  %v862_v14 = vld [vmem:[#allocation2 + $0xa0] sm:$0xff]  ;;  %v845_v20 = vld [vmem:[#allocation2 + $0x18] sm:$0xff]  ;;  %58 = vst [vmem:[#allocation1 + $0x2] ss:$4 sm:$0xff] %v42_v17  ;;  %v844_v23 = vld [vmem:[#allocation2 + $0x10] sm:$0xff] }
   0xd   :  { %517 = vmatpush.bf16.msra.mxu2 %v864_v5  ;;  %v40_v16 = vld [vmem:[%s1071_s0 + $0xe] sm:$0xff]  ;;  %v853_v21 = vld [vmem:[#allocation2 + $0x58] sm:$0xff]  ;;  %v39_v24 = vld [vmem:[%s1071_s0 + $0x8] sm:$0x3f]  ;;  %64 = vst [vmem:[#allocation1 + $0x21] ss:$4 sm:$0xff] %v41_v25 }
   0xe   :  { %530 = vmatpush.bf16.msra.mxu3 %v872_v7  ;;  %v44_v18 = vld [vmem:[%s1071_s0 + $0x2a] sm:$0xff]  ;;  %56 = vst [vmem:[#allocation1 + $0x1] ss:$4 sm:$0xff] %v40_v16  ;;  %v861_v22 = vld [vmem:[#allocation2 + $0x98] sm:$0xff]  ;;  %v852_v27 = vld [vmem:[#allocation2 + $0x50] sm:$0xff] }
   0xf   :  { %492 = vmatpush.bf16.msra.mxu0 %v847_v8  ;;  %v870_v19 = vld [vmem:[#allocation2 + $0xe0] sm:$0xff]  ;;  %60 = vst [vmem:[#allocation1 + $0x3] ss:$4 sm:$0xff] %v44_v18  ;;  %v869_v28 = vld [vmem:[#allocation2 + $0xd8] sm:$0xff]  ;;  %v45_v29 = vld [vmem:[%s1071_s0 + $0x32] sm:$0x3f] }
  0x10   :  { %505 = vmatpush.bf16.msra.mxu1 %v855_v9  ;;  %v43_v26 = vld [vmem:[%s1071_s0 + $0x24] sm:$0x3f]  ;;  %62 = vst [vmem:[#allocation1 + $0x20] ss:$4 sm:$0xff] %v39_v24  ;;  %v860_v30 = vld [vmem:[#allocation2 + $0x90] sm:$0xff]  ;;  %v843_v32 = vld [vmem:[#allocation2 + $0x8] sm:$0xff] }
  0x11   :  { %518 = vmatpush.bf16.msra.mxu2 %v863_v10  ;;  %66 = vst [vmem:[#allocation1 + $0x22] ss:$4 sm:$0xff] %v43_v26  ;;  %v868_v31 = vld [vmem:[#allocation2 + $0xd0] sm:$0xff]  ;;  %v851_v33 = vld [vmem:[#allocation2 + $0x48] sm:$0xff]  ;;  %v842_v35 = vld [vmem:[#allocation2] sm:$0xff] }
  0x12   :  { %531 = vmatpush.bf16.msra.mxu3 %v871_v11  ;;  %68 = vst [vmem:[#allocation1 + $0x23] ss:$4 sm:$0xff] %v45_v29  ;;  %v859_v34 = vld [vmem:[#allocation2 + $0x88] sm:$0xff]  ;;  %v850_v36 = vld [vmem:[#allocation2 + $0x40] sm:$0xff]  ;;  %v881_v40 = vld [vmem:[#allocation2 + $0x138] sm:$0xff] }
  0x13   :  { %493 = vmatpush.bf16.msra.mxu0 %v846_v12  ;;  %v867_v37 = vld [vmem:[#allocation2 + $0xc8] sm:$0xff]  ;;  %v889_v41 = vld [vmem:[#allocation2 + $0x178] sm:$0xff]  ;;  %v858_v42 = vld [vmem:[#allocation2 + $0x80] sm:$0xff] }
  0x14   :  { %506 = vmatpush.bf16.msra.mxu1 %v854_v13  ;;  %v866_v46 = vld [vmem:[#allocation2 + $0xc0] sm:$0xff]  ;;  %v880_v49 = vld [vmem:[#allocation2 + $0x130] sm:$0xff]  ;;  %v879_v53 = vld [vmem:[#allocation2 + $0x128] sm:$0xff] }
  0x15   :  { %519 = vmatpush.bf16.msra.mxu2 %v862_v14  ;;  %v890_v47 = vld [vmem:[#allocation2 + $0x180] sm:$0xff]  ;;  %v888_v50 = vld [vmem:[#allocation2 + $0x170] sm:$0xff]  ;;  %v887_v54 = vld [vmem:[#allocation2 + $0x168] sm:$0xff] }
  0x16   :  { %532 = vmatpush.bf16.msra.mxu3 %v870_v19  ;;  %v69_v38 = vld.sshfl [vmem:[#allocation1] sm:$0xff pattern:$0x73625140]  ;;  %v70_v39 = vld.sshfl [vmem:[#allocation1 + $0x8] sm:$0xff pattern:$0x73625140] }
  0x17   :  { %494 = vmatpush.bf16.msra.mxu0 %v845_v20  ;;  %v71_v43 = vld.sshfl [vmem:[#allocation1 + $0x10] sm:$0xff pattern:$0x73625140]  ;;  %v83_v44 = vpack.c.bf16 %v69_v38, %v69_v38  ;;  %v84_v45 = vpack.c.bf16 %v70_v39, %v70_v39  ;;  %v72_v48 = vld.sshfl [vmem:[#allocation1 + $0x18] sm:$0xff pattern:$0x73625140] }
  0x18   :  { %507 = vmatpush.bf16.msra.mxu1 %v853_v21  ;;  %v85_v51 = vpack.c.bf16 %v71_v43, %v71_v43  ;;  %v86_v52 = vpack.c.bf16 %v72_v48, %v72_v48  ;;  %v878_v55 = vld [vmem:[#allocation2 + $0x120] sm:$0xff]  ;;  %v877_v57 = vld [vmem:[#allocation2 + $0x118] sm:$0xff]  ;;  %v876_v60 = vld [vmem:[#allocation2 + $0x110] sm:$0xff] }
  0x19   :  { %520 = vmatpush.bf16.msra.mxu2 %v861_v22  ;;  %v886_v56 = vld [vmem:[#allocation2 + $0x160] sm:$0xff]  ;;  %v885_v58 = vld [vmem:[#allocation2 + $0x158] sm:$0xff]  ;;  %v75_v59 = vld.sshfl [vmem:[#allocation1 + $0x30] sm:$0xff pattern:$0x73625140] }
  0x1a   :  { %533 = vmatpush.bf16.msra.mxu3 %v869_v28  ;;  %v884_v61 = vld [vmem:[#allocation2 + $0x150] sm:$0xff]  ;;  %v89_v62 = vpack.c.bf16 %v75_v59, %v75_v59  ;;  %v875_v63 = vld [vmem:[#allocation2 + $0x108] sm:$0xff]  ;;  %v874_v1 = vld [vmem:[#allocation2 + $0x100] sm:$0xff] }
  0x1b   :  { %495 = vmatpush.bf16.msra.mxu0 %v844_v23  ;;  %v883_v0 = vld [vmem:[#allocation2 + $0x148] sm:$0xff]  ;;  %v882_v2 = vld [vmem:[#allocation2 + $0x140] sm:$0xff]  ;;  %v73_v3 = vld.sshfl [vmem:[#allocation1 + $0x20] sm:$0xff pattern:$0x73625140] }
  0x1c   :  { %508 = vmatpush.bf16.msra.mxu1 %v852_v27  ;;  %v74_v4 = vld.sshfl [vmem:[#allocation1 + $0x28] sm:$0xff pattern:$0x73625140]  ;;  %v87_v5 = vpack.c.bf16 %v73_v3, %v73_v3  ;;  %v599_v7 = vld [vmem:[%s1074_s3 + $0x78] sm:$0xff]  ;;  %v598_v8 = vld [vmem:[%s1074_s3 + $0x70] sm:$0xff] }
  0x1d   :  { %521 = vmatpush.bf16.msra.mxu2 %v860_v30  ;;  %v88_v6 = vpack.c.bf16 %v74_v4, %v74_v4  ;;  %v597_v9 = vld [vmem:[%s1074_s3 + $0x68] sm:$0xff]  ;;  %v596_v10 = vld [vmem:[%s1074_s3 + $0x60] sm:$0xff]  ;;  %v595_v11 = vld [vmem:[%s1074_s3 + $0x58] sm:$0xff] }
  0x1e   :  { %534 = vmatpush.bf16.msra.mxu3 %v868_v31  ;;  %v594_v12 = vld [vmem:[%s1074_s3 + $0x50] sm:$0xff]  ;;  %v593_v13 = vld [vmem:[%s1074_s3 + $0x48] sm:$0xff]  ;;  %v592_v14 = vld [vmem:[%s1074_s3 + $0x40] sm:$0xff] }
  0x1f   :  { %496 = vmatpush.bf16.msra.mxu0 %v843_v32  ;;  %v591_v15 = vld [vmem:[%s1074_s3 + $0x38] sm:$0xff]  ;;  %v590_v16 = vld [vmem:[%s1074_s3 + $0x30] sm:$0xff]  ;;  %v589_v17 = vld [vmem:[%s1074_s3 + $0x28] sm:$0xff] }
  0x20   :  { %509 = vmatpush.bf16.msra.mxu1 %v851_v33  ;;  %v588_v18 = vld [vmem:[%s1074_s3 + $0x20] sm:$0xff]  ;;  %v587_v19 = vld [vmem:[%s1074_s3 + $0x18] sm:$0xff]  ;;  %v586_v22 = vld [vmem:[%s1074_s3 + $0x10] sm:$0xff] }
  0x21   :  { %522 = vmatpush.bf16.msra.mxu2 %v859_v34  ;;  %v585_v23 = vld [vmem:[%s1074_s3 + $0x8] sm:$0xff]  ;;  %v584_v24 = vld [vmem:[%s1074_s3] sm:$0xff] }
  0x22   :  { %535 = vmatpush.bf16.msra.mxu3 %v867_v37  ;;  %v897_v29 = vld [vmem:[%s1073_s2] ss:$0 sm:$0xff] }
  0x23   :  { %497 = vmatpush.bf16.msra.mxu0 %v842_v35 }
  0x24   :  { %510 = vmatpush.bf16.msra.mxu1 %v850_v36 }
  0x25   :  { %523 = vmatpush.bf16.msra.mxu2 %v858_v42 }
  0x26   :  { %498 = vmatmul.bf16.vlgmr.msra.gmra.mxu0 %v83_v44  ;;  %536 = vmatpush.bf16.msra.mxu3 %v866_v46 }
  0x27   :  { %542 = vmatpush.bf16.msrb.mxu0 %v881_v40  ;;  %511 = vmatmul.bf16.vlgmr.msra.gmra.mxu1 %v84_v45 }
  0x28   :  { %555 = vmatpush.bf16.msrb.mxu1 %v889_v41  ;;  %524 = vmatmul.bf16.vlgmr.msra.gmra.mxu2 %v85_v51 }
  0x29   :  { %575 = vmatpush.bf16.msrb.mxu2 %v890_v47  ;;  %537 = vmatmul.bf16.vlgmr.msra.gmra.mxu3 %v86_v52  ;;  %v898_v47 = vld [vmem:[%s1075_s4] ss:$0 sm:$0xff] }
  0x2a   :  { %604 = vmatpush.msrb.mxu3 %v599_v7 }
  0x2b   :  { %543 = vmatpush.bf16.msrb.mxu0 %v880_v49 }
  0x2c   :  { %556 = vmatpush.bf16.msrb.mxu1 %v888_v50  ;;  %605 = vmatpush.msrb.mxu3 %v598_v8 }
  0x2e   :  { %606 = vmatpush.msrb.mxu3 %v597_v9 }
  0x2f   :  { %544 = vmatpush.bf16.msrb.mxu0 %v879_v53 }
  0x30   :  { %557 = vmatpush.bf16.msrb.mxu1 %v887_v54  ;;  %607 = vmatpush.msrb.mxu3 %v596_v10 }
  0x32   :  { %608 = vmatpush.msrb.mxu3 %v595_v11 }
  0x33   :  { %545 = vmatpush.bf16.msrb.mxu0 %v878_v55 }
  0x34   :  { %558 = vmatpush.bf16.msrb.mxu1 %v886_v56  ;;  %609 = vmatpush.msrb.mxu3 %v594_v12 }
  0x36   :  { %610 = vmatpush.msrb.mxu3 %v593_v13 }
  0x37   :  { %546 = vmatpush.bf16.msrb.mxu0 %v877_v57 }
  0x38   :  { %559 = vmatpush.bf16.msrb.mxu1 %v885_v58  ;;  %841 = vmatmul.msk.bf16.vlgmr.msrb.gmra.mxu2 %vm486_vm0, %v89_v62 }
  0x39   :  { %611 = vmatpush.msrb.mxu3 %v592_v14 }
  0x3b   :  { %547 = vmatpush.bf16.msrb.mxu0 %v876_v60  ;;  %612 = vmatpush.msrb.mxu3 %v591_v15 }
  0x3c   :  { %560 = vmatpush.bf16.msrb.mxu1 %v884_v61 }
  0x3d   :  { %613 = vmatpush.msrb.mxu3 %v590_v16 }
  0x3f   :  { %548 = vmatpush.bf16.msrb.mxu0 %v875_v63  ;;  %614 = vmatpush.msrb.mxu3 %v589_v17 }
  0x40   :  { %561 = vmatpush.bf16.msrb.mxu1 %v883_v0 }
  0x41   :  { %615 = vmatpush.msrb.mxu3 %v588_v18 }
  0x43   :  { %549 = vmatpush.bf16.msrb.mxu0 %v874_v1  ;;  %616 = vmatpush.msrb.mxu3 %v587_v19 }
  0x44   :  { %562 = vmatpush.bf16.msrb.mxu1 %v882_v2 }
  0x45   :  { %617 = vmatpush.msrb.mxu3 %v586_v22 }
  0x46   :  { %550 = vmatmul.bf16.vlgmr.msrb.gmra.mxu0 %v87_v5 }
  0x47   :  { %563 = vmatmul.bf16.vlgmr.msrb.gmra.mxu1 %v88_v6  ;;  %618 = vmatpush.msrb.mxu3 %v585_v23 }
  0x49   :  { %619 = vmatpush.msrb.mxu3 %v584_v24 }
  0xa3   :  { %v499_v20 = vpop.f32.mrf.mxu0 }
  0xa4   :  { %v512_v21 = vpop.f32.mrf.mxu1  ;;  %v500_v30 = vadd.f32 %v897_v29, %v499_v20 }
  0xa6   :  { %v513_v33 = vadd.f32 %v512_v21, %v500_v30 }
  0xab   :  { %v501_v25 = vpop.f32.mrf.mxu0  ;;  %v525_v27 = vpop.f32.mrf.mxu2 }
  0xac   :  { %v514_v26 = vpop.f32.mrf.mxu1  ;;  %v538_v28 = vpop.f32.mrf.mxu3  ;;  %v526_v34 = vadd.f32 %v525_v27, %v513_v33 }
  0xae   :  { %v539_v36 = vadd.f32 %v538_v28, %v526_v34 }
  0xb3   :  { %v527_v31 = vpop.f32.mrf.mxu2 }
  0xb4   :  { %v540_v32 = vpop.f32.mrf.mxu3 }
  0xbb   :  { %v577_v35 = vpop.f32.mrf.mxu2 }
  0xc3   :  { %v551_v37 = vpop.f32.mrf.mxu0  ;;  %v579_v41 = vpop.f32.mrf.mxu2 }
  0xc4   :  { %v564_v38 = vpop.f32.mrf.mxu1  ;;  %v552_v39 = vadd.f32 %v551_v37, %v539_v36 }
  0xc6   :  { %v565_v40 = vadd.f32 %v564_v38, %v552_v39 }
  0xc8   :  { %v578_v42 = vadd.f32 %v577_v35, %v565_v40 }
  0xca   :  { %vm581_vm1 = vcmp.ge.f32.partialorder %v578_v42, 0.0  ;;  %v582_v43 = vmul.f32 0.1, %v578_v42 }
  0xcb   :  { %v553_v44 = vpop.f32.mrf.mxu0 }
  0xcc   :  { %v566_v45 = vpop.f32.mrf.mxu1  ;;  %v583_v46 = vsel %vm581_vm1, %v578_v42, %v582_v43 }
  0xcd   :  { %620 = vmatmul.f32.vlgmr.msrb.gmra.mxu3 %v583_v46 }
 0x150   :  { %v621_v48 = vpop.f32.mrf.mxu3 }
 0x151   :  { %v622_v49 = vadd.f32 %v898_v47, %v621_v48 }
 0x153   :  { %625 = vst.msk [vmem:[#allocation5] sm:$0xff] %vm624_vm2, %v622_v49 }
 0x154   :  { %629 = vsyncadd [#allocation4], 96  ;;  %s632_s23 = sshll.u32 %s1076_s5, 4  ;;  %s954_s24 = smov [#allocation5]   ;;  %s633_s23 = int_to_ptr.hbm [resolvable:$true] %s632_s23 }
 0x155   :  { %s630_s1 = sshll.u32 %s954_s24, 4  ;;  %s955_s25 = smov 32   ;;  %s631_s1 = int_to_ptr.vmem [resolvable:$true] %s630_s1 }
 0x156   :  { %s956_s26 = smov 2  }
 0x157   :  { %638 = dma.vmem_to_hbm [thread:$0]  %s631_s1, 32, %s633_s23, [#allocation4], %s955_s25, %s955_s25, %s956_s26  }
 0x158   :  { %949 = dma.done.wait [#allocation4], 128  }
 0x159   :  { %950 = vsyncadd [#allocation4], 4294967168 }
 0x15a   :  { %643 = vsyncpa [#allocation3], 1 }
 0x15b   :  { %644 = vsyncpa [#allocation4], 1 }

</bundles_post_ra>
